<compile_context>
chip_gen: v7x
topology: tpu7x:2x2x1
jax: 0.10.0
libtpu: 0.0.40
codegen_flags: <defaults>
</compile_context>

<pallas_src>
import jax
import jax.numpy as jnp
from jax import lax
from jax.experimental import pallas as pl
from jax.experimental.pallas import tpu as pltpu


def _hlcf_kernel(aspect_ref,             # SMEM prefetch [B, 3] int32
                 local_ref, global_ref,  # VMEM (TS, H) bf16 (batch dim squeezed)
                 w1l_ref, w1g_ref,       # VMEM (H, H)  bf16
                 b1_ref,                 # VMEM (1, H)  f32
                 pooled_ref):            # out  (1, H)  f32 (batch dim squeezed),
                                         # resident accumulator across seq axis
    b = pl.program_id(0)
    s = pl.program_id(1)
    n_s = pl.num_programs(1)
    TS, H = local_ref.shape

    @pl.when(s == 0)
    def _():
        pooled_ref[...] = jnp.zeros_like(pooled_ref)

    # Rebuild the CDM keep-mask in-kernel from per-example SMEM scalars
    # (replaces a [B, S, H] float mask input entirely).
    a_start = aspect_ref[b, 0]
    a_end = aspect_ref[b, 1]
    srd = aspect_ref[b, 2]
    pos = s * TS + lax.broadcasted_iota(jnp.int32, (TS, H), 0)
    keep = jnp.logical_and(pos >= a_start - srd, pos <= a_end + srd)  # [TS, H]

    local = local_ref[...]
    masked_local = jnp.where(keep, local, jnp.zeros_like(local))      # VPU, bf16

    # concat([masked_local, global], -1) @ W1  ==  ml @ W1[:H] + g @ W1[H:]
    fused = (jnp.dot(masked_local, w1l_ref[...],
                     preferred_element_type=jnp.float32)
             + jnp.dot(global_ref[...], w1g_ref[...],
                       preferred_element_type=jnp.float32)
             + b1_ref[...])                                           # f32 [TS, H]
    t = jnp.tanh(fused)                                               # EUP, f32

    # Per-block pooled-sum accumulated straight into the resident output block
    # (avoids keeping the full [B,S,H] f32 activation live and a scratch copy).
    pooled_ref[...] += jnp.sum(t, axis=0, keepdims=True)              # [1, H]

    @pl.when(s == n_s - 1)
    def _():
        pooled_ref[...] *= 1.0 / (n_s * TS)                           # mean over S


def _pick_seq_tile(seq):
    for ts in (512, 256, 128, 64, 32, 16, 8):
        if seq % ts == 0:
            return ts
    return seq


def hlcf_bert_forward(local_feat, global_feat, aspect_info, params):
    """LCF/CDM fusion + mean-pool in Pallas; tiny C-wide head in plain XLA."""
    B, S, H = local_feat.shape
    TS = _pick_seq_tile(S)
    n_s = S // TS

    # bf16 operands for the MXU; accumulation stays f32 in-kernel.
    local_bf = local_feat.astype(jnp.bfloat16)
    global_bf = global_feat.astype(jnp.bfloat16)
    w1l = params["w1l"].astype(jnp.bfloat16)
    w1g = params["w1g"].astype(jnp.bfloat16)
    b1 = params["b1"].astype(jnp.float32)

    act_spec = pl.BlockSpec((None, TS, H), lambda b, s, aspect: (b, s, 0))
    w_spec = pl.BlockSpec((H, H), lambda b, s, aspect: (0, 0))
    b_spec = pl.BlockSpec((1, H), lambda b, s, aspect: (0, 0))
    out_spec = pl.BlockSpec((None, 1, H), lambda b, s, aspect: (b, 0, 0))

    # Explicit VMEM budget: double-buffered bf16 tiles for two activation
    # streams + whole W1 halves + bias + resident f32 output block, with margin.
    working_set = (2 * 2 * TS * H * 2          # local/global tiles, 2 buffers, bf16
                   + 2 * H * H * 2 + H * 4     # w1l/w1g (bf16) + b1 (f32)
                   + H * 4)                    # resident pooled output block (f32)
    vmem_limit = min(max(4 * working_set, 16 << 20), 48 << 20)

    pooled = pl.pallas_call(
        _hlcf_kernel,
        out_shape=jax.ShapeDtypeStruct((B, 1, H), jnp.float32),
        grid_spec=pltpu.PrefetchScalarGridSpec(
            num_scalar_prefetch=1,
            grid=(B, n_s),                      # reduction (seq) axis last
            in_specs=[act_spec, act_spec, w_spec, w_spec, b_spec],
            out_specs=out_spec,
        ),
        compiler_params=pltpu.CompilerParams(
            dimension_semantics=("parallel", "arbitrary"),
            vmem_limit_bytes=vmem_limit,
        ),
    )(aspect_info, local_bf, global_bf, w1l, w1g, b1)

    pooled = pooled.reshape(B, H)
    # C=3 classifier head in plain XLA (negligible FLOPs; keeps the kernel
    # output lane-dense instead of a 3/128-lane masked store).
    return pooled @ params["w2"] + params["b2"]


def init_params(key, hidden, num_polarities):
    k1, k2, k3 = jax.random.split(key, 3)
    scale1 = 1.0 / jnp.sqrt(2.0 * hidden)
    scale2 = 1.0 / jnp.sqrt(float(hidden))
    return {
        # Linear(2H -> H), stored as two HxH halves (local / global).
        "w1l": jax.random.normal(k1, (hidden, hidden), jnp.float32) * scale1,
        "w1g": jax.random.normal(k2, (hidden, hidden), jnp.float32) * scale1,
        "b1": jnp.zeros((1, hidden), jnp.float32),
        # Dense classifier H -> C.
        "w2": jax.random.normal(k3, (hidden, num_polarities), jnp.float32) * scale2,
        "b2": jnp.zeros((1, num_polarities), jnp.float32),
    }


def _reference(local_feat, global_feat, aspect_info, params):
    """Pure-JAX f32 reference of the same surrogate forward pass."""
    B, S, H = local_feat.shape
    pos = jnp.arange(S)[None, :]
    a_start = aspect_info[:, 0:1]
    a_end = aspect_info[:, 1:2]
    srd = aspect_info[:, 2:3]
    dist = jnp.maximum(a_start - pos, 0) + jnp.maximum(pos - a_end, 0)
    keep = (dist <= srd).astype(local_feat.dtype)[:, :, None]     # [B, S, 1]
    ml = local_feat * keep
    fused = jnp.tanh(jnp.einsum("bsh,hk->bsk", ml, params["w1l"])
                     + jnp.einsum("bsh,hk->bsk", global_feat, params["w1g"])
                     + params["b1"])
    pooled = fused.mean(axis=1)
    return pooled @ params["w2"] + params["b2"]


if __name__ == "__main__":
    B, S, H, C = 2, 8, 32, 3  # batch, seq, hidden, polarity classes

    key = jax.random.PRNGKey(0)
    k_local, k_global, k_params = jax.random.split(key, 3)

    # Synthetic BERT outputs (local-context and global-context branches).
    local_feat = jax.random.normal(k_local, (B, S, H), jnp.float32)
    global_feat = jax.random.normal(k_global, (B, S, H), jnp.float32)

    # Per-example (aspect_start, aspect_end, SRD) — replaces the [B,S,H] mask.
    aspect_info = jnp.array([[2, 3, 2],
                             [1, 4, 2]], dtype=jnp.int32)

    params = init_params(k_params, H, C)

    logits = hlcf_bert_forward(local_feat, global_feat, aspect_info, params)
    jax.block_until_ready(logits)

    assert logits.shape == (B, C) and logits.dtype == jnp.float32
    assert bool(jnp.all(jnp.isfinite(logits)))

    ref = _reference(local_feat, global_feat, aspect_info, params)
    assert bool(jnp.allclose(logits, ref, atol=1e-1, rtol=1e-1)), (logits, ref)

    print("KERNEL_OK")
</pallas_src>

<mosaic_0001>
module attributes {stable_mosaic.version = 11 : i64} {
  func.func @_hlcf_kernel(%arg0: i32, %arg1: i32, %arg2: memref<2x3xi32, #tpu.memory_space<smem>>, %arg3: memref<1x8x32xbf16, #tpu.memory_space<vmem>>, %arg4: memref<1x8x32xbf16, #tpu.memory_space<vmem>>, %arg5: memref<32x32xbf16, #tpu.memory_space<vmem>>, %arg6: memref<32x32xbf16, #tpu.memory_space<vmem>>, %arg7: memref<1x32xf32, #tpu.memory_space<vmem>>, %arg8: memref<1x1x32xf32, #tpu.memory_space<vmem>>) attributes {dimension_semantics = [#tpu.dimension_semantics<parallel>, #tpu.dimension_semantics<arbitrary>], iteration_bounds = array<i64: 2, 1>, scalar_prefetch = 1 : i64, scratch_operands = 0 : i64, tpu.core_type = #tpu.core_type<tc>, window_params = [{transform_indices = @transform_0, window_bounds = array<i64: 1, 8, 32>}, {transform_indices = @transform_1, window_bounds = array<i64: 1, 8, 32>}, {pipeline_mode = #tpu.pipeline_mode<synchronous>, transform_indices = @transform_2, window_bounds = array<i64: 32, 32>}, {pipeline_mode = #tpu.pipeline_mode<synchronous>, transform_indices = @transform_3, window_bounds = array<i64: 32, 32>}, {pipeline_mode = #tpu.pipeline_mode<synchronous>, transform_indices = @transform_4, window_bounds = array<i64: 1, 32>}, {transform_indices = @transform_5, window_bounds = array<i64: 1, 1, 32>}]} {
    %c0_i32 = arith.constant 0 : i32
    %0 = arith.cmpi eq, %arg1, %c0_i32 : i32
    %1 = arith.extui %0 : i1 to i32
    %c0_i32_0 = arith.constant 0 : i32
    %2 = arith.cmpi ne, %1, %c0_i32_0 : i32
    scf.if %2 {
      %cst_24 = arith.constant 0.000000e+00 : f32
      %46 = vector.broadcast %cst_24 : f32 to vector<1x32xf32>
      %c0_25 = arith.constant 0 : index
      %c0_26 = arith.constant 0 : index
      %c0_27 = arith.constant 0 : index
      %47 = vector.load %arg8[%c0_25, %c0_26, %c0_27] : memref<1x1x32xf32, #tpu.memory_space<vmem>>, vector<1x1x32xf32>
      %48 = vector.shape_cast %47 : vector<1x1x32xf32> to vector<1x32xf32>
      %49 = vector.shape_cast %46 : vector<1x32xf32> to vector<1x1x32xf32>
      tpu.vector_store %arg8[%c0_25, %c0_26, %c0_27], %49 {strides = array<i32>} : memref<1x1x32xf32, #tpu.memory_space<vmem>>, vector<1x1x32xf32>,
    } else {
    }
    %3 = arith.index_cast %arg0 : i32 to index
    %c0 = arith.constant 0 : index
    %4 = memref.load %arg2[%3, %c0] : memref<2x3xi32, #tpu.memory_space<smem>>
    %5 = arith.index_cast %arg0 : i32 to index
    %c1 = arith.constant 1 : index
    %6 = memref.load %arg2[%5, %c1] : memref<2x3xi32, #tpu.memory_space<smem>>
    %7 = arith.index_cast %arg0 : i32 to index
    %c2 = arith.constant 2 : index
    %8 = memref.load %arg2[%7, %c2] : memref<2x3xi32, #tpu.memory_space<smem>>
    %c8_i32 = arith.constant 8 : i32
    %9 = arith.muli %arg1, %c8_i32 : i32
    %10 = tpu.iota {dimensions = array<i32: 0>} : vector<8x32xi32>
    %11 = vector.broadcast %9 : i32 to vector<8x32xi32>
    %12 = arith.addi %11, %10 : vector<8x32xi32>
    %13 = arith.subi %4, %8 : i32
    %14 = vector.broadcast %13 : i32 to vector<8x32xi32>
    %15 = arith.cmpi sge, %12, %14 : vector<8x32xi32>
    %16 = arith.addi %6, %8 : i32
    %17 = vector.broadcast %16 : i32 to vector<8x32xi32>
    %18 = arith.cmpi sle, %12, %17 : vector<8x32xi32>
    %19 = arith.andi %15, %18 : vector<8x32xi1>
    %c0_1 = arith.constant 0 : index
    %c0_2 = arith.constant 0 : index
    %c0_3 = arith.constant 0 : index
    %20 = vector.load %arg3[%c0_1, %c0_2, %c0_3] : memref<1x8x32xbf16, #tpu.memory_space<vmem>>, vector<1x8x32xbf16>
    %21 = vector.shape_cast %20 : vector<1x8x32xbf16> to vector<8x32xbf16>
    %cst = arith.constant 0.000000e+00 : bf16
    %22 = vector.broadcast %cst : bf16 to vector<8x32xbf16>
    %23 = arith.select %19, %21, %22 : vector<8x32xi1>, vector<8x32xbf16>
    %c0_4 = arith.constant 0 : index
    %c0_5 = arith.constant 0 : index
    %24 = vector.load %arg5[%c0_4, %c0_5] : memref<32x32xbf16, #tpu.memory_space<vmem>>, vector<32x32xbf16>
    %cst_6 = arith.constant dense<0.000000e+00> : vector<8x32xf32>
    %25 = tpu.matmul %23, %24, %cst_6 {dimension_numbers = #tpu.dot_dimension_numbers<[1], [0], [0], [1], [0, 0, 1, 1], [], []>} : vector<8x32xbf16>, vector<32x32xbf16>, vector<8x32xf32> -> vector<8x32xf32>
    %c0_7 = arith.constant 0 : index
    %c0_8 = arith.constant 0 : index
    %c0_9 = arith.constant 0 : index
    %26 = vector.load %arg4[%c0_7, %c0_8, %c0_9] : memref<1x8x32xbf16, #tpu.memory_space<vmem>>, vector<1x8x32xbf16>
    %27 = vector.shape_cast %26 : vector<1x8x32xbf16> to vector<8x32xbf16>
    %c0_10 = arith.constant 0 : index
    %c0_11 = arith.constant 0 : index
    %28 = vector.load %arg6[%c0_10, %c0_11] : memref<32x32xbf16, #tpu.memory_space<vmem>>, vector<32x32xbf16>
    %cst_12 = arith.constant dense<0.000000e+00> : vector<8x32xf32>
    %29 = tpu.matmul %27, %28, %cst_12 {dimension_numbers = #tpu.dot_dimension_numbers<[1], [0], [0], [1], [0, 0, 1, 1], [], []>} : vector<8x32xbf16>, vector<32x32xbf16>, vector<8x32xf32> -> vector<8x32xf32>
    %30 = arith.addf %25, %29 : vector<8x32xf32>
    %c0_13 = arith.constant 0 : index
    %c0_14 = arith.constant 0 : index
    %31 = vector.load %arg7[%c0_13, %c0_14] : memref<1x32xf32, #tpu.memory_space<vmem>>, vector<1x32xf32>
    %32 = vector.broadcast %31 : vector<1x32xf32> to vector<8x32xf32>
    %33 = arith.addf %30, %32 : vector<8x32xf32>
    %34 = math.tanh %33 : vector<8x32xf32>
    %c0_15 = arith.constant 0 : index
    %c0_16 = arith.constant 0 : index
    %c0_17 = arith.constant 0 : index
    %35 = vector.load %arg8[%c0_15, %c0_16, %c0_17] : memref<1x1x32xf32, #tpu.memory_space<vmem>>, vector<1x1x32xf32>
    %36 = vector.shape_cast %35 : vector<1x1x32xf32> to vector<1x32xf32>
    %cst_18 = arith.constant dense<0.000000e+00> : vector<32xf32>
    %37 = vector.multi_reduction <add>, %34, %cst_18 [0] : vector<8x32xf32> to vector<32xf32>
    %38 = vector.shape_cast %37 : vector<32xf32> to vector<1x32xf32>
    %39 = arith.addf %36, %38 : vector<1x32xf32>
    %c0_19 = arith.constant 0 : index
    %c0_20 = arith.constant 0 : index
    %c0_21 = arith.constant 0 : index
    %40 = vector.load %arg8[%c0_19, %c0_20, %c0_21] : memref<1x1x32xf32, #tpu.memory_space<vmem>>, vector<1x1x32xf32>
    %41 = vector.shape_cast %40 : vector<1x1x32xf32> to vector<1x32xf32>
    %42 = vector.shape_cast %39 : vector<1x32xf32> to vector<1x1x32xf32>
    tpu.vector_store %arg8[%c0_19, %c0_20, %c0_21], %42 {strides = array<i32>} : memref<1x1x32xf32, #tpu.memory_space<vmem>>, vector<1x1x32xf32>,
    %c0_i32_22 = arith.constant 0 : i32
    %43 = arith.cmpi eq, %arg1, %c0_i32_22 : i32
    %44 = arith.extui %43 : i1 to i32
    %c0_i32_23 = arith.constant 0 : i32
    %45 = arith.cmpi ne, %44, %c0_i32_23 : i32
    scf.if %45 {
      %c0_24 = arith.constant 0 : index
      %c0_25 = arith.constant 0 : index
      %c0_26 = arith.constant 0 : index
      %46 = vector.load %arg8[%c0_24, %c0_25, %c0_26] : memref<1x1x32xf32, #tpu.memory_space<vmem>>, vector<1x1x32xf32>
      %47 = vector.shape_cast %46 : vector<1x1x32xf32> to vector<1x32xf32>
      %cst_27 = arith.constant 1.250000e-01 : f32
      %48 = vector.broadcast %cst_27 : f32 to vector<1x32xf32>
      %49 = arith.mulf %47, %48 : vector<1x32xf32>
      %c0_28 = arith.constant 0 : index
      %c0_29 = arith.constant 0 : index
      %c0_30 = arith.constant 0 : index
      %50 = vector.load %arg8[%c0_28, %c0_29, %c0_30] : memref<1x1x32xf32, #tpu.memory_space<vmem>>, vector<1x1x32xf32>
      %51 = vector.shape_cast %50 : vector<1x1x32xf32> to vector<1x32xf32>
      %52 = vector.shape_cast %49 : vector<1x32xf32> to vector<1x1x32xf32>
      tpu.vector_store %arg8[%c0_28, %c0_29, %c0_30], %52 {strides = array<i32>} : memref<1x1x32xf32, #tpu.memory_space<vmem>>, vector<1x1x32xf32>,
    } else {
    }
    return
  }
  func.func @transform_0(%arg0: i32, %arg1: i32, %arg2: memref<2x3xi32, #tpu.memory_space<smem>>) -> (i32, i32, i32) {
    %c0_i32 = arith.constant 0 : i32
    %c0_i32_0 = arith.constant 0 : i32
    return %arg0, %arg1, %c0_i32 : i32, i32, i32
  }
  func.func @transform_1(%arg0: i32, %arg1: i32, %arg2: memref<2x3xi32, #tpu.memory_space<smem>>) -> (i32, i32, i32) {
    %c0_i32 = arith.constant 0 : i32
    %c0_i32_0 = arith.constant 0 : i32
    return %arg0, %arg1, %c0_i32 : i32, i32, i32
  }
  func.func @transform_2(%arg0: i32, %arg1: i32, %arg2: memref<2x3xi32, #tpu.memory_space<smem>>) -> (i32, i32) {
    %c0_i32 = arith.constant 0 : i32
    %c0_i32_0 = arith.constant 0 : i32
    %c0_i32_1 = arith.constant 0 : i32
    return %c0_i32, %c0_i32_0 : i32, i32
  }
  func.func @transform_3(%arg0: i32, %arg1: i32, %arg2: memref<2x3xi32, #tpu.memory_space<smem>>) -> (i32, i32) {
    %c0_i32 = arith.constant 0 : i32
    %c0_i32_0 = arith.constant 0 : i32
    %c0_i32_1 = arith.constant 0 : i32
    return %c0_i32, %c0_i32_0 : i32, i32
  }
  func.func @transform_4(%arg0: i32, %arg1: i32, %arg2: memref<2x3xi32, #tpu.memory_space<smem>>) -> (i32, i32) {
    %c0_i32 = arith.constant 0 : i32
    %c0_i32_0 = arith.constant 0 : i32
    %c0_i32_1 = arith.constant 0 : i32
    return %c0_i32, %c0_i32_0 : i32, i32
  }
  func.func @transform_5(%arg0: i32, %arg1: i32, %arg2: memref<2x3xi32, #tpu.memory_space<smem>>) -> (i32, i32, i32) {
    %c0_i32 = arith.constant 0 : i32
    %c0_i32_0 = arith.constant 0 : i32
    %c0_i32_1 = arith.constant 0 : i32
    return %arg0, %c0_i32, %c0_i32_0 : i32, i32, i32
  }
}

</mosaic_0001>

<bundles_post_ra>
// kernel: tpu_custom_call.1
= control target key start
LH: loop header
LB: loop body
LE: loop exit
PB: predicated region body
PF: predicated region fallthrough
CT: control target
= control target key end

     0   :  { %s1370_s0 = inlined_call_operand.hbm [shape: s32[2,3], index: 0, kind: input, shape index: {}]   ;;  %s1371_s1 = inlined_call_operand.hbm [shape: bf16[2,8,32], index: 1, kind: input, shape index: {}]   ;;  %s1372_s2 = inlined_call_operand.hbm [shape: bf16[2,8,32], index: 2, kind: input, shape index: {}]   ;;  %s1373_s3 = inlined_call_operand.hbm [shape: bf16[32,32], index: 3, kind: input, shape index: {}]   ;;  %s1374_s4 = inlined_call_operand.hbm [shape: bf16[32,32], index: 4, kind: input, shape index: {}]   ;;  %s1375_s5 = inlined_call_operand.vmem [shape: f32[1,32], index: 5, kind: input, shape index: {}]   ;;  %s1376_s6 = inlined_call_operand.hbm [shape: f32[2,1,32], index: 6, kind: output, shape index: {}]  }
   0x1   :  { %1383 = sst [smem:[#allocation21_spill]] %s1373_s3  ;;  %s780_s23 = scalar_lea.hbm %s1370_s0, 32 }
   0x2   :  { %1384 = sst [smem:[#allocation22_spill]] %s1374_s4  ;;  %p781_p0 = scmp.ne.s32.totalorder %s1370_s0, %s780_s23 }
   0x3   :  { %p784_p1 = scmp.lt.u32.totalorder %s780_s23, %s1370_s0 }
   0x5   :  { %p786_p2 = pnand %p784_p1, %p781_p0 }
   0x7   :  { %789 = shalt.err (!%p786_p2)  }
   0x8   :  { %s1004_s28 = smov [#allocation3]  }
   0x9   :  { %12 = dma.hbm_to_smem %s1370_s0, 32, %s1004_s28, [#allocation2] }
   0xa   :  { %958 = dma.done.wait [#allocation2], 32 }
   0xb   :  { %959 = vsyncadd [#allocation2], 4294967264 }
   0xc   :  { %14 = sfence }
   0xd   :  { %15 = vsyncpa [#allocation5], 0 }
   0xe   :  { %17 = vsyncpa [#allocation5 + $0x1], 0 }
   0xf   :  { %18 = vsyncpa [#allocation8], 0 }
  0x10   :  { %20 = vsyncpa [#allocation8 + $0x1], 0 }
  0x11   :  { %21 = vsyncpa [#allocation11], 0 }
  0x12   :  { %22 = vsyncpa [#allocation6], 0 }
  0x13   :  { %24 = vsyncpa [#allocation6 + $0x1], 0  ;;  %s1061_s7 = smov 0   ;;  %s1063_s8 = smov 0  }
  0x14   :  { %s1065_s9 = smov 0   ;;  %s1067_s10 = smov 0  }
  0x15   :  { %s1069_s11 = smov 0   ;;  %s1071_s0 = smov 0  }
  0x16 LB: > { %1385 = sst [smem:[#allocation19_spill]] %s998_s11  ;;  %s1092_s12 = sadd.s32 4294967295, %s1002_s0   ;;  %s1002_s0 = sphi %s1071_s0, %s30_s0   ;;  %s998_s11 = sphi %s1069_s11, %s1406_s11   ;;  %s994_s10 = sphi %s1067_s10, %s1405_s10   ;;  %s990_s9 = sphi %s1065_s9, %s1409_s9   ;;  %s986_s8 = sphi %s1063_s8, %s1408_s8   ;;  %s982_s7 = sphi %s1061_s7, %s1407_s7  }
  0x17   : > { %s634_s13 = sadd.s32 4294967294, %s1002_s0   ;;  %p64_p3 = scmp.ne.s32.totalorder %s986_s8, %s982_s7 }
  0x18   : > { %p1377_p4 = scmp.eq.s32.totalorder %s1092_s12, 0  ;;  %p185_p6 = scmp.eq.s32.totalorder %s634_s13, 1 }
  0x19   : > { %p635_p8 = scmp.ge.s32.totalorder %s1002_s0, 1  ;;  %p192_p10 = scmp.lt.s32.totalorder %s1002_s0, 3 }
  0x1a   : > { %p1101_p7 = por %p1377_p4, %p64_p3  ;;  %p1106_p9 = por %p185_p6, %p64_p3 }
  0x1b   : > { %p1111_p11 = pnand %p635_p8, %p192_p10  ;;  %s1005_s17 = smov [#allocation9]  }
  0x1c   : > { %s1386_s14 = scalar_select %p1101_p7, 1, 0 }
  0x1d   : > { %s1387_s15 = scalar_select %p1106_p9, 1, 0 }
  0x1e   : > { %s1388_s16 = scalar_select %p1111_p11, 1, 0 }
  0x1f   : > { %s204_s18 = sshll.u32 %s1005_s17, 4  ;;  %p695_p12 = pneg %p1111_p11  ;;  %s1115_s18 = int_to_ptr.vmem [resolvable:$true] %s204_s18 }
  0x20   : > { %s1006_s20 = smov [#allocation10]   ;;  %s1390_s3 = sld [smem:[#allocation21_spill]] }
  0x21   : > { %p1122_p0 = pnand %p695_p12, %p1377_p4  ;;  %s217_s21 = sshll.u32 %s1006_s20, 4  ;;  %s1126_s21 = int_to_ptr.vmem [resolvable:$true] %s217_s21 }
  0x23   : > { %p792_p2 = pneg %p1122_p0 }
  0x26   : > { %s790_s24 = scalar_lea.hbm %s1390_s3, 256 }
  0x27   : > { %p791_p1 = scmp.ne.s32.totalorder %s1390_s3, %s790_s24  ;;  %p797_p8 = scmp.lt.u32.totalorder %s790_s24, %s1390_s3 }
  0x29   : > { %p793_p3 = pnand %p792_p2, %p791_p1 }
  0x2b   : > { %p794_p6 = pneg %p793_p3 }
  0x2d   : > { %p799_p10 = pnand %p797_p8, %p794_p6 }
  0x2f   : > { %802 = shalt.err (!%p799_p10)
}
  0x30   : > { %s803_s29 = scalar_lea.vmem %s1115_s18, 256  ;;  %p811_p5 = scmp.lt.s32.totalorder %s1115_s18, %s1115_s18 }
  0x31   : > { %p804_p12 = scmp.ne.s32.totalorder %s1115_s18, %s803_s29  ;;  %p812_p1 = scmp.lt.s32.totalorder %s803_s29, %s803_s29 }
  0x33   : > { %p806_p13 = pnand %p804_p12, %p792_p2  ;;  %p813_p3 = por %p812_p1, %p811_p5 }
  0x35   : > { %p807_p4 = pneg %p806_p13 }
  0x37   : > { %p814_p9 = pnand %p813_p3, %p807_p4 }
  0x39   : > { %817 = shalt.err (!%p814_p9)
}
  0x3a   : > { %s1007_s30 = smov 64   ;;  %s1008_s13 = smov 4  }
  0x3b   : > { %698 = dma.hbm_to_vmem [thread:$0]  (!%p1122_p0), %s1390_s3, 256, %s1115_s18, [#allocation8], %s1007_s30, %s1007_s30, %s1008_s13  }
  0x3c   : > { %s1391_s4 = sld [smem:[#allocation22_spill]] }
  0x42   : > { %s818_s24 = scalar_lea.hbm %s1391_s4, 256 }
  0x43   : > { %p819_p5 = scmp.ne.s32.totalorder %s1391_s4, %s818_s24  ;;  %p825_p13 = scmp.lt.u32.totalorder %s818_s24, %s1391_s4 }
  0x45   : > { %p821_p4 = pnand %p819_p5, %p792_p2 }
  0x47   : > { %p822_p9 = pneg %p821_p4 }
  0x49   : > { %p827_p6 = pnand %p825_p13, %p822_p9 }
  0x4b   : > { %830 = shalt.err (!%p827_p6)
}
  0x4c   : > { %s831_s18 = scalar_lea.vmem %s1126_s21, 256  ;;  %p839_p1 = scmp.lt.s32.totalorder %s1126_s21, %s1126_s21 }
  0x4d   : > { %p832_p8 = scmp.ne.s32.totalorder %s1126_s21, %s831_s18  ;;  %p840_p3 = scmp.lt.s32.totalorder %s831_s18, %s831_s18 }
  0x4f   : > { %p834_p10 = pnand %p832_p8, %p792_p2  ;;  %p841_p5 = por %p840_p3, %p839_p1 }
  0x51   : > { %p835_p12 = pneg %p834_p10 }
  0x53   : > { %p842_p4 = pnand %p841_p5, %p835_p12 }
  0x55   : > { %845 = shalt.err (!%p842_p4)
}
  0x56   : > { %701 = dma.hbm_to_vmem [thread:$0]  (!%p1122_p0), %s1391_s4, 256, %s1126_s21, [#allocation11], %s1007_s30, %s1007_s30, %s1008_s13  }
  0x57   : > { %s42_s20 = sadd.s32 1, %s998_s11  ;;  %s51_s22 = sadd.s32 1, %s990_s9 }
  0x58   : > { %p44_p2 = scmp.ge.s32.totalorder %s42_s20, 2  ;;  %p58_p9 = scmp.ne.s32.totalorder %s990_s9, %s986_s8 }
  0x59   : > { %p59_p13 = scmp.eq.s32.totalorder %s1002_s0, 0  ;;  %p715_p6 = scmp.lt.s32.totalorder %s1002_s0, 2 }
  0x5a   : > { %s1411_s20 = smov (%p44_p2, %s42_s20), 0  ;;  %p1393_p10 = scmp.eq.s32.totalorder %s1092_s12, 1 }
  0x5b   : > { %1392 = sst [smem:[#allocation20_spill]] %s1411_s20  ;;  %p60_p8 = por %p59_p13, %p58_p9 }
  0x5c   : > { %p1190_p12 = por %p1393_p10, %p58_p9  ;;  %s46_s23 = ssub.s32 %s998_s11, %s1411_s20 }
  0x5d   : > { %s234_s24 = sand.u32 1, %s990_s9   ;;  %p49_p1 = scmp.eq.s32.totalorder %s46_s23, 0 }
  0x5e   : > { %s1394_s19 = scalar_select %p1190_p12, 1, 0 }
  0x5f   : > { %s1197_s21 = sshll.u32 %s234_s24, 2  ;;  %s640_s30 = sshll.u32 %s998_s11, 6 }
  0x60   : > { %s1201_s13 = scalar_select %p49_p1, %s990_s9, %s51_s22  }
  0x61   : > { %s1206_s27 = scalar_lea.hbm %s1371_s1, %s640_s30  ;;  %s238_s28 = scalar_lea.vmem [#allocation4], %s1197_s21 }
  0x62   : > { %s246_s18 = sshll.u32 %s238_s28, 4  ;;  %p1211_p0 = pnand %p715_p6, %p60_p8  ;;  %s1215_s18 = int_to_ptr.vmem [resolvable:$true] %s246_s18 }
  0x63   : > { %s1220_s23 = scalar_lea.hbm %s1372_s2, %s640_s30  ;;  %s235_s25 = scalar_lea.sflag [#allocation5], %s234_s24 }
  0x64   : > { %s846_s26 = scalar_lea.hbm %s1206_s27, 64  ;;  %p848_p5 = pneg %p1211_p0 }
  0x65   : > { %p847_p3 = scmp.ne.s32.totalorder %s1206_s27, %s846_s26  ;;  %s851_s4 = scalar_lea.hbm %s1371_s1, 128 }
  0x66   : > { %p852_p9 = scmp.lt.u32.totalorder %s1206_s27, %s1371_s1  ;;  %p853_p13 = scmp.lt.u32.totalorder %s851_s4, %s846_s26 }
  0x67   : > { %p849_p4 = pnand %p848_p5, %p847_p3  ;;  %p855_p8 = scmp.lt.u32.totalorder %s846_s26, %s1206_s27 }
  0x68   : > { %p854_p6 = por %p853_p13, %p852_p9 }
  0x69   : > { %p850_p2 = pneg %p849_p4 }
  0x6a   : > { %p856_p10 = por %p855_p8, %p854_p6 }
  0x6c   : > { %p857_p1 = pnand %p856_p10, %p850_p2 }
  0x6e   : > { %860 = shalt.err (!%p857_p1)
}
  0x6f   : > { %s861_s24 = scalar_lea.vmem %s1215_s18, 64  ;;  %s1009_s3 = smov [#allocation4]  }
  0x70   : > { %p862_p3 = scmp.ne.s32.totalorder %s1215_s18, %s861_s24  ;;  %s866_s30 = sshll.u32 %s1009_s3, 4  ;;  %s867_s30 = int_to_ptr.vmem [resolvable:$false] %s866_s30 }
  0x71   : > { %s868_s11 = scalar_lea.vmem %s867_s30, 128  ;;  %p869_p7 = scmp.lt.s32.totalorder %s1215_s18, %s867_s30 }
  0x72   : > { %p864_p4 = pnand %p862_p3, %p848_p5  ;;  %p870_p9 = scmp.lt.s32.totalorder %s868_s11, %s861_s24 }
  0x74   : > { %p865_p12 = pneg %p864_p4  ;;  %p871_p13 = por %p870_p9, %p869_p7 }
  0x76   : > { %p872_p6 = pnand %p871_p13, %p865_p12 }
  0x78   : > { %875 = shalt.err (!%p872_p6)
}
  0x79   : > { %705 = dma.hbm_to_vmem [thread:$0]  (!%p1211_p0), %s1206_s27, 64, %s1215_s18, %s235_s25  }
  0x7a   : > { %s253_s4 = sand.u32 1, %s1002_s0   ;;  %s257_s20 = scalar_lea.vmem [#allocation7], %s1197_s21 }
  0x7b   : > { %s265_s17 = sshll.u32 %s257_s20, 4  ;;  %s254_s22 = scalar_lea.sflag [#allocation8], %s253_s4  ;;  %s266_s17 = int_to_ptr.vmem [resolvable:$true] %s265_s17 }
  0x7c   : > { %s876_s26 = scalar_lea.hbm %s1220_s23, 64  ;;  %s881_s3 = scalar_lea.hbm %s1372_s2, 128 }
  0x7d   : > { %p877_p7 = scmp.ne.s32.totalorder %s1220_s23, %s876_s26  ;;  %p882_p8 = scmp.lt.u32.totalorder %s1220_s23, %s1372_s2 }
  0x7e   : > { %p883_p10 = scmp.lt.u32.totalorder %s881_s3, %s876_s26  ;;  %p885_p3 = scmp.lt.u32.totalorder %s876_s26, %s1220_s23 }
  0x7f   : > { %p879_p12 = pnand %p877_p7, %p848_p5 }
  0x80   : > { %p884_p1 = por %p883_p10, %p882_p8 }
  0x81   : > { %p880_p2 = pneg %p879_p12 }
  0x82   : > { %p886_p4 = por %p885_p3, %p884_p1 }
  0x84   : > { %p887_p9 = pnand %p886_p4, %p880_p2 }
  0x86   : > { %890 = shalt.err (!%p887_p9)
}
  0x87   : > { %s891_s21 = scalar_lea.vmem %s266_s17, 64  ;;  %s1010_s27 = smov [#allocation7]  }
  0x88   : > { %p892_p13 = scmp.ne.s32.totalorder %s266_s17, %s891_s21  ;;  %s896_s18 = sshll.u32 %s1010_s27, 4  ;;  %s897_s18 = int_to_ptr.vmem [resolvable:$false] %s896_s18 }
  0x89   : > { %s898_s25 = scalar_lea.vmem %s897_s18, 128  ;;  %p899_p12 = scmp.lt.s32.totalorder %s266_s17, %s897_s18 }
  0x8a   : > { %p894_p6 = pnand %p892_p13, %p848_p5  ;;  %p900_p11 = scmp.lt.s32.totalorder %s898_s25, %s891_s21 }
  0x8c   : > { %p895_p7 = pneg %p894_p6  ;;  %p901_p8 = por %p900_p11, %p899_p12 }
  0x8e   : > { %p902_p10 = pnand %p901_p8, %p895_p7 }
  0x90   : > { %905 = shalt.err (!%p902_p10)
}
  0x91   : > { %708 = dma.hbm_to_vmem [thread:$0]  (!%p1211_p0), %s1220_s23, 64, %s266_s17, %s254_s22  }
  0x92   : > { %p1396_p2 = scmp.ne.s32.totalorder %s1388_s16, 0 }
  0x93   : > { %s1271_s4 = sand.u32 (!%p1396_p2), 1, %s986_s8   ;;  %p1397_p11 = scmp.ne.s32.totalorder (!%p1396_p2), %s1386_s14, 0 }
  0x94   : > { %274 = sbr.rel (%p1396_p2) target bundleno = 446 (0x1be), region = 40  ;;  %s644_s20 = sshll.u32 (!%p1396_p2), %s1271_s4, 2 }
  0x95   : > { %s277_s26 = scalar_lea.sflag (!%p1396_p2), [#allocation5], %s1271_s4  ;;  %s1275_s28 = scalar_lea.vmem (!%p1396_p2), [#allocation4], %s644_s20 }
  0x9b   : > { %961 = dma.done.wait (%p1397_p11), %s277_s26, 64  }
  0x9c   : > { %963 = vsyncadd (%p1397_p11), %s277_s26, 4294967232  ;;  %s285_s29 = sand.u32 1, %s1092_s12   ;;  %s1282_s23 = scalar_lea.vmem [#allocation7], %s644_s20 }
  0x9d   : > { %s286_s16 = scalar_lea.sflag [#allocation8], %s285_s29 }
  0x9e   : > { %965 = dma.done.wait (%p1397_p11), %s286_s16, 64  }
  0x9f   : > { %967 = vsyncadd (%p1397_p11), %s286_s16, 4294967232  ;;  %p1398_p0 = scmp.eq.s32.totalorder %s1092_s12, 0 }
  0xa1   : > { %969 = dma.done.wait (%p1398_p0), [#allocation8], 256   ;;  %p1399_p5 = pmov %p1398_p0 }
  0xa2   : > { %p1400_p1 = pmov %p1398_p0 }
  0xa3   : > { %971 = vsyncadd (%p1399_p5), [#allocation8], 4294967040 }
  0xa4   : > { %973 = dma.done.wait (%p1400_p1), [#allocation11], 256   ;;  %p1401_p3 = pmov %p1398_p0 }
  0xa5   : > { %s648_s17 = sshll.u32 %s994_s10, 7  ;;  %v1011_v0 = vmov 0.0   ;;  %vm1012_vm0 = vmmov 0   ;;  %v342_v1 = vlaneseq  ;;  %v774_v2 = vld [vmem:[#allocation10] sm:$0xff]   ;;  %v775_v4 = vld [vmem:[#allocation9] sm:$0xff]   ;;  %v776_v5 = vld [vmem:[#allocation10 + $0x8] sm:$0xff]  }
  0xa6   : > { %975 = vsyncadd (%p1401_p3), [#allocation11], 4294967040  ;;  %665 = vmatprep.subr.bf16.mxu0 %v1011_v0  ;;  %673 = vmatprep.subr.bf16.mxu1 %v1011_v0  ;;  %s336_s22 = sld [smem:[#allocation3 + %s648_s17]]  ;;  %s337_s14 = sadd.s32 1, %s648_s17  ;;  %v777_v6 = vld [vmem:[#allocation9 + $0x8] sm:$0xff]   ;;  %vm377_vm4 = vcmask 261120  }
  0xa7   : > { %669 = vmatprep.mubr.msk.bf16.mxu0 %vm1012_vm0, %v1011_v0  ;;  %677 = vmatprep.mubr.msk.bf16.mxu1 %vm1012_vm0, %v1011_v0  ;;  %s338_s24 = sld [smem:[#allocation3 + %s337_s14]]  ;;  %s339_s3 = sadd.s32 2, %s648_s17  ;;  %v343_v3 = vshrl.u32 %v342_v1, 7  ;;  %v353_v9 = vld [vmem:[%s1275_s28] sm:$0xf]  ;;  %vm333_vm6 = vcmask 253952  }
  0xa8   : > { %s340_s30 = sld [smem:[#allocation3 + %s339_s3]]  ;;  %666 = vmatpush3.bf16.msra.mxu0 %v774_v2  ;;  %674 = vmatpush3.bf16.msra.mxu1 %v775_v4  ;;  %v360_v10 = vld [vmem:[%s1282_s23] sm:$0xf]  ;;  %s1302_s21 = scalar_lea.vmem [#allocation12], %s1271_s4  ;;  %v655_v14 = vld [vmem:[%s1375_s5] ss:$0 sm:$0xff] }
  0xa9   : > { %667 = vmatprep.subr.bf16.mxu0 %v1011_v0  ;;  %675 = vmatprep.subr.bf16.mxu1 %v1011_v0  ;;  %334 = vst.msk [vmem:[%s1302_s21] sm:$0x1] %vm333_vm6, %v1011_v0  ;;  %s656_s25 = sshll.u32 %s994_s10, 4  ;;  %s515_s20 = sshll.u32 %s1302_s21, 4  ;;  %s1321_s20 = int_to_ptr.vmem [resolvable:$true] %s515_s20 }
  0xaa   : > { %s1319_s29 = scalar_lea.hbm %s1376_s6, %s656_s25  ;;  %s503_s16 = scalar_lea.sflag [#allocation6], %s1271_s4 }
  0xab   : > { %s906_s23 = scalar_lea.vmem %s1321_s20, 16  ;;  %p1402_p9 = scmp.ne.s32.totalorder %s1394_s19, 0 }
  0xac   : > { %668 = vmatpush3.bf16.msra.mxu0 %v776_v5  ;;  %676 = vmatpush3.bf16.msra.mxu1 %v777_v6  ;;  %p907_p4 = scmp.ne.s32.totalorder %s1321_s20, %s906_s23  ;;  %s1013_s10 = smov [#allocation12]  }
  0xad   : > { %s910_s17 = sshll.u32 %s1013_s10, 4  ;;  %s911_s17 = int_to_ptr.vmem [resolvable:$false] %s910_s17 }
  0xae   : > { %s346_s12 = ssub.s32 %s336_s22, %s340_s30  ;;  %s349_s11 = sadd.s32 %s340_s30, %s338_s24 }
  0xaf   : > { %v347_v7 = vstv %s346_s12  ;;  %v350_v8 = vstv %s349_s11  ;;  %670 = vmatmul.mubr.msk.bf16.vlgmr.msra.gmra.mrb[0].mxu0 %vm377_vm4, %v360_v10  ;;  %p908_p13 = pnand %p907_p4, %p1402_p9  ;;  %s912_s22 = scalar_lea.vmem %s911_s17, 32 }
  0xb0   : > { %vm348_vm1 = vcmp.ge.s32.totalorder %v343_v3, %v347_v7  ;;  %vm351_vm2 = vcmp.le.s32.totalorder %v343_v3, %v350_v8  ;;  %v485_v30 = vld [vmem:[%s1302_s21] sm:$0x1]  ;;  %p913_p7 = scmp.lt.s32.totalorder %s1321_s20, %s911_s17  ;;  %p914_p12 = scmp.lt.s32.totalorder %s912_s22, %s906_s23 }
  0xb1   : > { %vm352_vm3 = vmand %vm348_vm1, %vm351_vm2  ;;  %p909_p6 = pneg %p908_p13 }
  0xb2   : > { %vm354_vm5 = vmpackc.low %vm352_vm3, %vm352_vm3  ;;  %p915_p8 = por %p914_p12, %p913_p7 }
  0xb3   : > { %v355_v11 = vsel %vm354_vm5, %v353_v9, 0 }
  0xb4   : > { %678 = vmatmul.mubr.msk.bf16.vlgmr.msra.gmra.mrb[0].mxu1 %vm377_vm4, %v355_v11  ;;  %p916_p10 = pnand %p915_p8, %p909_p6 }
 0x182   : > { %v415_v12 = vpop.f32.mrb[0].mxu0 }
 0x183   : > { %v671_v15 = vpop.f32.mrb[1].mxu0 }
 0x184   : > { %v418_v18 = vpop.f32.mrb[2].mxu0 }
 0x185   : > { %v672_v20 = vpop.f32.mrb[3].mxu0 }
 0x187   : > { %v470_v13 = vpop.f32.mrb[0].mxu1 }
 0x188   : > { %v471_v16 = vadd.f32 %v470_v13, %v415_v12  ;;  %v679_v17 = vpop.f32.mrb[1].mxu1 }
 0x189   : > { %v473_v19 = vpop.f32.mrb[2].mxu1 }
 0x18a   : > { %v483_v21 = vadd.f32 %v655_v14, %v471_v16  ;;  %v680_v22 = vpop.f32.mrb[3].mxu1 }
 0x18c   : > { %778 = vtanh.f32 %v483_v21 }
 0x196   : > { %v779_v23 = vpop.eup %778 }
 0x197   : > { %v486_v24 = vsel %vm377_vm4, %v779_v23, 0.0 }
 0x198   : > { %v487_v25 = vrot.slane %v486_v24, 4 }
 0x19a   : > { %v488_v26 = vadd.f32 %v487_v25, %v486_v24 }
 0x19c   : > { %v489_v27 = vrot.slane %v488_v26, 2 }
 0x19e   : > { %v490_v28 = vadd.f32 %v489_v27, %v488_v26 }
 0x1a0   : > { %v491_v29 = vrot.slane %v490_v28, 1 }
 0x1a2   : > { %v492_v31 = vadd.f32 %v491_v29, %v490_v28 }
 0x1a4   : > { %v493_v32 = vadd.f32 %v492_v31, %v485_v30 }
 0x1a6   : > { %495 = vst.msk [vmem:[%s1302_s21] sm:$0x1] %vm333_vm6, %v493_v32 }
 0x1ad   : > { %v499_v33 = vld [vmem:[%s1302_s21] sm:$0x1] }
 0x1ae   : > { %v500_v34 = vmul.f32 0.125, %v499_v33 }
 0x1b0   : > { %501 = vst.msk [vmem:[%s1302_s21] sm:$0x1] %vm333_vm6, %v500_v34 }
 0x1b1   : > { %919 = shalt.err (!%p916_p10)
}
 0x1b2   : > { %s920_s4 = scalar_lea.hbm %s1319_s29, 16  ;;  %s924_s3 = scalar_lea.hbm %s1376_s6, 32 }
 0x1b3   : > { %p921_p2 = scmp.ne.s32.totalorder %s1319_s29, %s920_s4  ;;  %p925_p5 = scmp.lt.u32.totalorder %s1319_s29, %s1376_s6 }
 0x1b4   : > { %p926_p1 = scmp.lt.u32.totalorder %s924_s3, %s920_s4  ;;  %p928_p4 = scmp.lt.u32.totalorder %s920_s4, %s1319_s29 }
 0x1b5   : > { %p922_p11 = pnand %p921_p2, %p1402_p9 }
 0x1b6   : > { %p927_p3 = por %p926_p1, %p925_p5 }
 0x1b7   : > { %p923_p0 = pneg %p922_p11 }
 0x1b8   : > { %p929_p13 = por %p928_p4, %p927_p3 }
 0x1ba   : > { %p930_p6 = pnand %p929_p13, %p923_p0 }
 0x1bc   : > { %933 = shalt.err (!%p930_p6)
}
 0x1bd   : > { %693 = dma.vmem_to_hbm [thread:$0]  (%p1402_p9), %s1321_s20, 16, %s1319_s29, %s503_s16  }
 0x1be PF: > { %s527_s11 = sand.u32 1, %s982_s7   ;;  %p1403_p7 = scmp.ne.s32.totalorder %s1387_s15, 0 }
 0x1bf   : > { %p1404_p12 = scmp.ge.s32.totalorder %s1002_s0, 2  ;;  %s528_s21 = scalar_lea.sflag [#allocation6], %s527_s11 }
 0x1c1   : > { %p710_p8 = pnand %p1404_p12, %p1403_p7 }
 0x1c3   : > { %977 = dma.done.wait (!%p710_p8), %s528_s21, 16  }
 0x1c4   : > { %979 = vsyncadd (!%p710_p8), %s528_s21, 4294967280  ;;  %s30_s0 = sadd.s32 1, %s1002_s0   ;;  %s1405_s10 = sld [smem:[#allocation19_spill]] }
 0x1c5   : > { %p27_p10 = scmp.ge.s32.totalorder %s30_s0, 4   ;;  %s1406_s11 = sld [smem:[#allocation20_spill]] }
 0x1c6   : > { %s1407_s7 = smov %s986_s8  ;;  %s1408_s8 = smov %s990_s9 }
 0x1c7   : > { %s1409_s9 = smov %s1201_s13  ;;  %29 = sbr.rel (!%p27_p10) target bundleno = 22 (0x16), region = 114 }
 0x1ce   :  { %532 = vsyncpa [#allocation5], 1 }
 0x1cf   :  { %534 = vsyncpa [#allocation5 + $0x1], 1 }
 0x1d0   :  { %535 = vsyncpa [#allocation8], 1 }
 0x1d1   :  { %537 = vsyncpa [#allocation8 + $0x1], 1 }
 0x1d2   :  { %538 = vsyncpa [#allocation11], 1 }
 0x1d3   :  { %539 = vsyncpa [#allocation6], 1 }
 0x1d4   :  { %541 = vsyncpa [#allocation6 + $0x1], 1 }

</bundles_post_ra>
